<compile_context>
chip_gen: v7x
topology: tpu7x:2x2x1
jax: 0.10.0
libtpu: 0.0.40
codegen_flags: <defaults>
</compile_context>

<pallas_src>
import functools

import numpy as np
import jax
import jax.numpy as jnp
from jax.experimental import pallas as pl
from jax.experimental.pallas import tpu as pltpu


def rnn_fused_kernel(tok_ref, table_ref, whh_ref, wfc_ref, bfc_ref, out_ref,
                     *, seq_len, batch, hidden, vocab_pad):
    """Entire forward pass in one invocation.

    tok_ref   : (T*B, 1) int32  time-major flattened token ids       (VMEM)
    table_ref : (vocab_pad, H)  folded table = emb @ W_ih^T + bias   (VMEM)
    whh_ref   : (H, H)          == weight_hh_l0.T                    (VMEM)
    wfc_ref   : (1, H)          == fc.weight (row form)              (VMEM)
    bfc_ref   : (1, 1)          == fc.bias                           (VMEM)
    out_ref   : (B, 1)          sigmoid(fc(h_T))                     (VMEM)
    """
    rows = seq_len * batch

    # In-kernel embedding gather of the *pre-projected* rows via one-hot MXU
    # matmul (exact: selectors are 0/1).  Result is x_t @ W_ih^T + bias for
    # every (t, b), time-major.
    tok = tok_ref[...]                                              # (T*B, 1) int32
    lane_ids = jax.lax.broadcasted_iota(jnp.int32, (rows, vocab_pad), 1)
    onehot = (tok == lane_ids).astype(jnp.float32)                  # (T*B, vocab_pad)
    xproj = jnp.dot(onehot, table_ref[...],
                    preferred_element_type=jnp.float32)             # (T*B, H)

    whh = whh_ref[...]                                              # load once
    h = jnp.zeros((batch, hidden), jnp.float32)                     # h_0 = 0, in vregs

    # Strictly serial recurrence, fully unrolled (seq_len small & static).
    # Per step only: h @ W_hh + precomputed xproj[t] -> tanh.
    for t in range(seq_len):
        xp_t = xproj[t * batch:(t + 1) * batch, :]                  # static 8-row slice
        h = jnp.tanh(xp_t + jnp.dot(h, whh, preferred_element_type=jnp.float32))

    # Fused fc head + sigmoid: VPU multiply + cross-lane (XLU) reduce.
    logit = jnp.sum(h * wfc_ref[...], axis=-1, keepdims=True) + bfc_ref[...]   # (B, 1)
    out_ref[...] = 1.0 / (1.0 + jnp.exp(-logit))


def fold_rnn_params(params, lane=128):
    """One-time (offline) fold: Embedding -> input projection -> +bias.

    Exact because Embedding followed by a Linear on its output is a linear
    chain: gathering row v of (emb @ W_ih^T + b) equals emb[v] @ W_ih^T + b.
    """
    table = params["embedding"] @ params["w_ih_t"] + params["bias"]   # (V, H)
    vocab = table.shape[0]
    vpad = ((vocab + lane - 1) // lane) * lane
    table = jnp.pad(table, ((0, vpad - vocab), (0, 0)))
    return {
        "table": table,                                  # (vocab_pad, H)
        "w_hh_t": params["w_hh_t"],                      # (H, H)
        "w_fc_row": params["w_fc_t"].T,                  # (1, H)
        "b_fc": params["b_fc"],                          # (1, 1)
    }


@jax.jit
def rnn_model_forward(tokens, folded):
    """tokens: (B, T) int32 token ids. Returns (B, 1) float32 sigmoid output."""
    B, T = tokens.shape
    vocab_pad, H = folded["table"].shape

    # Time-major flatten of the token ids (row r = t*B + b).
    tok_tm = tokens.T.reshape(T * B, 1).astype(jnp.int32)

    kernel = functools.partial(
        rnn_fused_kernel, seq_len=T, batch=B, hidden=H, vocab_pad=vocab_pad)

    return pl.pallas_call(
        kernel,
        out_shape=jax.ShapeDtypeStruct((B, 1), jnp.float32),
        in_specs=[
            pl.BlockSpec(memory_space=pltpu.MemorySpace.VMEM),   # tokens (T*B, 1)
            pl.BlockSpec(memory_space=pltpu.MemorySpace.VMEM),   # folded table
            pl.BlockSpec(memory_space=pltpu.MemorySpace.VMEM),   # W_hh^T
            pl.BlockSpec(memory_space=pltpu.MemorySpace.VMEM),   # w_fc row
            pl.BlockSpec(memory_space=pltpu.MemorySpace.VMEM),   # b_fc
        ],
        out_specs=pl.BlockSpec(memory_space=pltpu.MemorySpace.VMEM),
    )(tok_tm, folded["table"], folded["w_hh_t"], folded["w_fc_row"], folded["b_fc"])


def reference_forward(tokens, params):
    """Pure-JAX reference matching the PyTorch module semantics."""
    x_emb = params["embedding"][tokens]                   # (B, T, E)

    def step(h, x_t):
        h_new = jnp.tanh(x_t @ params["w_ih_t"] + h @ params["w_hh_t"] + params["bias"])
        return h_new, None

    B = tokens.shape[0]
    H = params["w_hh_t"].shape[0]
    h0 = jnp.zeros((B, H), jnp.float32)
    h_last, _ = jax.lax.scan(step, h0, jnp.transpose(x_emb, (1, 0, 2)))
    return jax.nn.sigmoid(h_last @ params["w_fc_t"] + params["b_fc"])


if __name__ == "__main__":
    # Small shapes consistent with the module.
    vocab_size = 50
    embedding_dim = 128
    hidden_dim = 64
    batch = 8
    seq_len = 8

    key = jax.random.PRNGKey(0)
    k_emb, k_ih, k_hh, k_bih, k_bhh, k_fc, k_bfc, k_tok = jax.random.split(key, 8)

    scale_rnn = 1.0 / np.sqrt(hidden_dim)
    params = {
        # nn.Embedding(vocab_size, embedding_dim): N(0, 1)
        "embedding": jax.random.normal(k_emb, (vocab_size, embedding_dim), jnp.float32),
        # nn.RNN weights (stored pre-transposed for x @ W^T convention)
        "w_ih_t": jax.random.uniform(
            k_ih, (embedding_dim, hidden_dim), jnp.float32, -scale_rnn, scale_rnn),
        "w_hh_t": jax.random.uniform(
            k_hh, (hidden_dim, hidden_dim), jnp.float32, -scale_rnn, scale_rnn),
        # combined bias = bias_ih + bias_hh, kept 2D for TPU layout
        "bias": (
            jax.random.uniform(k_bih, (1, hidden_dim), jnp.float32, -scale_rnn, scale_rnn)
            + jax.random.uniform(k_bhh, (1, hidden_dim), jnp.float32, -scale_rnn, scale_rnn)
        ),
        # nn.Linear(hidden_dim, 1)
        "w_fc_t": jax.random.uniform(
            k_fc, (hidden_dim, 1), jnp.float32, -scale_rnn, scale_rnn),
        "b_fc": jax.random.uniform(k_bfc, (1, 1), jnp.float32, -scale_rnn, scale_rnn),
    }

    tokens = jax.random.randint(k_tok, (batch, seq_len), 0, vocab_size, dtype=jnp.int32)

    # One-time offline fold of Embedding + W_ih + bias.
    folded = jax.tree_util.tree_map(jax.block_until_ready, fold_rnn_params(params))

    out = rnn_model_forward(tokens, folded)
    out = jax.block_until_ready(out)

    ref = jax.block_until_ready(reference_forward(tokens, params))
    np.testing.assert_allclose(np.asarray(out), np.asarray(ref), rtol=1e-4, atol=1e-5)

    assert out.shape == (batch, 1)
    print("KERNEL_OK")
</pallas_src>

<mosaic_0001>
module attributes {stable_mosaic.version = 11 : i64} {
  func.func @rnn_fused_kernel(%arg0: memref<64x1xi32, #tpu.memory_space<vmem>>, %arg1: memref<128x64xf32, #tpu.memory_space<vmem>>, %arg2: memref<64x64xf32, #tpu.memory_space<vmem>>, %arg3: memref<1x64xf32, #tpu.memory_space<vmem>>, %arg4: memref<1x1xf32, #tpu.memory_space<vmem>>, %arg5: memref<8x1xf32, #tpu.memory_space<vmem>>) attributes {dimension_semantics = [], scalar_prefetch = 0 : i64, scratch_operands = 0 : i64, tpu.core_type = #tpu.core_type<tc>} {
    %c0 = arith.constant 0 : index
    %c0_0 = arith.constant 0 : index
    %0 = vector.load %arg0[%c0, %c0_0] : memref<64x1xi32, #tpu.memory_space<vmem>>, vector<64x1xi32>
    %1 = tpu.iota {dimensions = array<i32: 1>} : vector<64x128xi32>
    %2 = vector.broadcast %0 : vector<64x1xi32> to vector<64x128xi32>
    %3 = arith.cmpi eq, %2, %1 : vector<64x128xi32>
    %4 = arith.extui %3 : vector<64x128xi1> to vector<64x128xi32>
    %5 = arith.sitofp %4 : vector<64x128xi32> to vector<64x128xf32>
    %c0_1 = arith.constant 0 : index
    %c0_2 = arith.constant 0 : index
    %6 = vector.load %arg1[%c0_1, %c0_2] : memref<128x64xf32, #tpu.memory_space<vmem>>, vector<128x64xf32>
    %cst = arith.constant dense<0.000000e+00> : vector<64x64xf32>
    %7 = tpu.matmul %5, %6, %cst {dimension_numbers = #tpu.dot_dimension_numbers<[1], [0], [0], [1], [0, 0, 1, 1], [], []>} : vector<64x128xf32>, vector<128x64xf32>, vector<64x64xf32> -> vector<64x64xf32>
    %c0_3 = arith.constant 0 : index
    %c0_4 = arith.constant 0 : index
    %8 = vector.load %arg2[%c0_3, %c0_4] : memref<64x64xf32, #tpu.memory_space<vmem>>, vector<64x64xf32>
    %cst_5 = arith.constant 0.000000e+00 : f32
    %9 = vector.broadcast %cst_5 : f32 to vector<8x64xf32>
    %10 = vector.extract_strided_slice %7 {offsets = [0, 0], sizes = [8, 64], strides = [1, 1]} : vector<64x64xf32> to vector<8x64xf32>
    %cst_6 = arith.constant dense<0.000000e+00> : vector<8x64xf32>
    %11 = tpu.matmul %9, %8, %cst_6 {dimension_numbers = #tpu.dot_dimension_numbers<[1], [0], [0], [1], [0, 0, 1, 1], [], []>} : vector<8x64xf32>, vector<64x64xf32>, vector<8x64xf32> -> vector<8x64xf32>
    %12 = arith.addf %10, %11 : vector<8x64xf32>
    %13 = math.tanh %12 : vector<8x64xf32>
    %14 = vector.extract_strided_slice %7 {offsets = [8, 0], sizes = [8, 64], strides = [1, 1]} : vector<64x64xf32> to vector<8x64xf32>
    %cst_7 = arith.constant dense<0.000000e+00> : vector<8x64xf32>
    %15 = tpu.matmul %13, %8, %cst_7 {dimension_numbers = #tpu.dot_dimension_numbers<[1], [0], [0], [1], [0, 0, 1, 1], [], []>} : vector<8x64xf32>, vector<64x64xf32>, vector<8x64xf32> -> vector<8x64xf32>
    %16 = arith.addf %14, %15 : vector<8x64xf32>
    %17 = math.tanh %16 : vector<8x64xf32>
    %18 = vector.extract_strided_slice %7 {offsets = [16, 0], sizes = [8, 64], strides = [1, 1]} : vector<64x64xf32> to vector<8x64xf32>
    %cst_8 = arith.constant dense<0.000000e+00> : vector<8x64xf32>
    %19 = tpu.matmul %17, %8, %cst_8 {dimension_numbers = #tpu.dot_dimension_numbers<[1], [0], [0], [1], [0, 0, 1, 1], [], []>} : vector<8x64xf32>, vector<64x64xf32>, vector<8x64xf32> -> vector<8x64xf32>
    %20 = arith.addf %18, %19 : vector<8x64xf32>
    %21 = math.tanh %20 : vector<8x64xf32>
    %22 = vector.extract_strided_slice %7 {offsets = [24, 0], sizes = [8, 64], strides = [1, 1]} : vector<64x64xf32> to vector<8x64xf32>
    %cst_9 = arith.constant dense<0.000000e+00> : vector<8x64xf32>
    %23 = tpu.matmul %21, %8, %cst_9 {dimension_numbers = #tpu.dot_dimension_numbers<[1], [0], [0], [1], [0, 0, 1, 1], [], []>} : vector<8x64xf32>, vector<64x64xf32>, vector<8x64xf32> -> vector<8x64xf32>
    %24 = arith.addf %22, %23 : vector<8x64xf32>
    %25 = math.tanh %24 : vector<8x64xf32>
    %26 = vector.extract_strided_slice %7 {offsets = [32, 0], sizes = [8, 64], strides = [1, 1]} : vector<64x64xf32> to vector<8x64xf32>
    %cst_10 = arith.constant dense<0.000000e+00> : vector<8x64xf32>
    %27 = tpu.matmul %25, %8, %cst_10 {dimension_numbers = #tpu.dot_dimension_numbers<[1], [0], [0], [1], [0, 0, 1, 1], [], []>} : vector<8x64xf32>, vector<64x64xf32>, vector<8x64xf32> -> vector<8x64xf32>
    %28 = arith.addf %26, %27 : vector<8x64xf32>
    %29 = math.tanh %28 : vector<8x64xf32>
    %30 = vector.extract_strided_slice %7 {offsets = [40, 0], sizes = [8, 64], strides = [1, 1]} : vector<64x64xf32> to vector<8x64xf32>
    %cst_11 = arith.constant dense<0.000000e+00> : vector<8x64xf32>
    %31 = tpu.matmul %29, %8, %cst_11 {dimension_numbers = #tpu.dot_dimension_numbers<[1], [0], [0], [1], [0, 0, 1, 1], [], []>} : vector<8x64xf32>, vector<64x64xf32>, vector<8x64xf32> -> vector<8x64xf32>
    %32 = arith.addf %30, %31 : vector<8x64xf32>
    %33 = math.tanh %32 : vector<8x64xf32>
    %34 = vector.extract_strided_slice %7 {offsets = [48, 0], sizes = [8, 64], strides = [1, 1]} : vector<64x64xf32> to vector<8x64xf32>
    %cst_12 = arith.constant dense<0.000000e+00> : vector<8x64xf32>
    %35 = tpu.matmul %33, %8, %cst_12 {dimension_numbers = #tpu.dot_dimension_numbers<[1], [0], [0], [1], [0, 0, 1, 1], [], []>} : vector<8x64xf32>, vector<64x64xf32>, vector<8x64xf32> -> vector<8x64xf32>
    %36 = arith.addf %34, %35 : vector<8x64xf32>
    %37 = math.tanh %36 : vector<8x64xf32>
    %38 = vector.extract_strided_slice %7 {offsets = [56, 0], sizes = [8, 64], strides = [1, 1]} : vector<64x64xf32> to vector<8x64xf32>
    %cst_13 = arith.constant dense<0.000000e+00> : vector<8x64xf32>
    %39 = tpu.matmul %37, %8, %cst_13 {dimension_numbers = #tpu.dot_dimension_numbers<[1], [0], [0], [1], [0, 0, 1, 1], [], []>} : vector<8x64xf32>, vector<64x64xf32>, vector<8x64xf32> -> vector<8x64xf32>
    %40 = arith.addf %38, %39 : vector<8x64xf32>
    %41 = math.tanh %40 : vector<8x64xf32>
    %c0_14 = arith.constant 0 : index
    %c0_15 = arith.constant 0 : index
    %42 = vector.load %arg3[%c0_14, %c0_15] : memref<1x64xf32, #tpu.memory_space<vmem>>, vector<1x64xf32>
    %43 = vector.broadcast %42 : vector<1x64xf32> to vector<8x64xf32>
    %44 = arith.mulf %41, %43 : vector<8x64xf32>
    %cst_16 = arith.constant dense<0.000000e+00> : vector<8xf32>
    %45 = vector.multi_reduction <add>, %44, %cst_16 [1] : vector<8x64xf32> to vector<8xf32>
    %46 = vector.shape_cast %45 : vector<8xf32> to vector<8x1xf32>
    %c0_17 = arith.constant 0 : index
    %c0_18 = arith.constant 0 : index
    %47 = vector.load %arg4[%c0_17, %c0_18] : memref<1x1xf32, #tpu.memory_space<vmem>>, vector<1x1xf32>
    %48 = vector.broadcast %47 : vector<1x1xf32> to vector<8x1xf32>
    %49 = arith.addf %46, %48 : vector<8x1xf32>
    %cst_19 = arith.constant 0.000000e+00 : f32
    %50 = vector.broadcast %cst_19 : f32 to vector<8x1xf32>
    %51 = arith.subf %50, %49 : vector<8x1xf32>
    %52 = math.exp %51 : vector<8x1xf32>
    %cst_20 = arith.constant 1.000000e+00 : f32
    %53 = vector.broadcast %cst_20 : f32 to vector<8x1xf32>
    %54 = arith.addf %53, %52 : vector<8x1xf32>
    %cst_21 = arith.constant 1.000000e+00 : f32
    %55 = vector.broadcast %cst_21 : f32 to vector<8x1xf32>
    %56 = arith.divf %55, %54 : vector<8x1xf32>
    %c0_22 = arith.constant 0 : index
    %c0_23 = arith.constant 0 : index
    %57 = vector.load %arg5[%c0_22, %c0_23] : memref<8x1xf32, #tpu.memory_space<vmem>>, vector<8x1xf32>
    tpu.vector_store %arg5[%c0_22, %c0_23], %56 {strides = array<i32>} : memref<8x1xf32, #tpu.memory_space<vmem>>, vector<8x1xf32>,
    return
  }
}

</mosaic_0001>

<bundles_post_ra>
// kernel: rnn_model_forward.1
= control target key start
LH: loop header
LB: loop body
LE: loop exit
PB: predicated region body
PF: predicated region fallthrough
CT: control target
= control target key end

     0   :  { %v1313_v0 = vmov 0   ;;  %v1314_v7 = vmov 0.0|0.0   ;;  %vm1315_vm0 = vmmov 0   ;;  %v1316_v18 = vmov 0.0   ;;  %s1556_s0 = inlined_call_operand.vmem [shape: s32[64,1], index: 0, kind: input, shape index: {}]   ;;  %s1557_s1 = inlined_call_operand.vmem [shape: f32[128,64], index: 1, kind: input, shape index: {}]   ;;  %s1558_s2 = inlined_call_operand.vmem [shape: f32[64,64], index: 2, kind: input, shape index: {}]   ;;  %s1559_s4 = inlined_call_operand.<no memory space> [shape: f32[1,1], index: 4, kind: input, shape index: {}]   ;;  %s1560_s3 = inlined_call_operand.vmem [shape: f32[1,64], index: 3, kind: input, shape index: {}]   ;;  %s1561_s5 = inlined_call_operand.vmem [shape: f32[8,1], index: 5, kind: output, shape index: {}]  }
   0x1   :  { %1291 = vset.pattern.permute.xlu0 %v1313_v0  ;;  %v22_v1 = vld [vmem:[%s1556_s0] sm:$0xff]  ;;  %1292 = vset.pattern.permute.xlu1 %v1313_v0  ;;  %v24_v2 = vld [vmem:[%s1556_s0 + $0x10] sm:$0xff]  ;;  %v23_v3 = vld [vmem:[%s1556_s0 + $0x8] sm:$0xff]  ;;  %v30_v46 = vlaneseq  ;;  %v1317_v50 = vmov 1.0   ;;  %vm209_vm8 = vcmask 523264   ;;  %vm835_vm10 = vcmask 7168  }
   0x2   :  { %33 = vperm.xlu0 %1291, %v22_v1   ;;  %39 = vperm.xlu1 %1292, %v24_v2   ;;  %v25_v4 = vld [vmem:[%s1556_s0 + $0x18] sm:$0xff]  ;;  %v80_v5 = vld [vmem:[%s1557_s1] sm:$0xff]  ;;  %v81_v6 = vld [vmem:[%s1557_s1 + $0x8] sm:$0xff] }
   0x3   :  { %1190 = vmatprep.subr.bf16.mxu1 %v1314_v7  ;;  %v1158_v8 = vpack.c.bf16 %v81_v6, %v80_v5  ;;  %v82_v9 = vld [vmem:[%s1557_s1 + $0x10] sm:$0xff]  ;;  %v83_v10 = vld [vmem:[%s1557_s1 + $0x18] sm:$0xff]  ;;  %v84_v12 = vld [vmem:[%s1557_s1 + $0x20] sm:$0xff]  ;;  %1022 = vmatprep.mubr.msk.f32.mxu1 %vm1315_vm0, %v1316_v18  ;;  %v31_v47 = vand.u32 127, %v30_v46 }
   0x4   :  { %v1162_v11 = vpack.c.bf16 %v83_v10, %v82_v9  ;;  %v85_v13 = vld [vmem:[%s1557_s1 + $0x28] sm:$0xff]  ;;  %v201_v14 = vld [vmem:[%s1558_s2] sm:$0xff]  ;;  %v203_v20 = vld [vmem:[%s1558_s2 + $0x10] sm:$0xff] }
   0x5   :  { %v26_v15 = vld [vmem:[%s1556_s0 + $0x20] sm:$0xff]  ;;  %v27_v16 = vld [vmem:[%s1556_s0 + $0x28] sm:$0xff]  ;;  %1159 = vmatprep.subr.bf16.mxu0 %v1158_v8  ;;  %v204_v21 = vld [vmem:[%s1558_s2 + $0x18] sm:$0xff]  ;;  %v1166_v22 = vpack.c.bf16 %v85_v13, %v84_v12 }
   0x6   :  { %36 = vperm.xlu0 %1291, %v23_v3   ;;  %42 = vperm.xlu1 %1292, %v25_v4   ;;  %v202_v17 = vld [vmem:[%s1558_s2 + $0x8] sm:$0xff]  ;;  %v86_v23 = vld [vmem:[%s1557_s1 + $0x30] sm:$0xff]  ;;  %v87_v24 = vld [vmem:[%s1557_s1 + $0x38] sm:$0xff]  ;;  %v1411_v26 = vpack.c.bf16 %v204_v21, %v203_v20 }
   0x7   :  { %1161 = vmatpush3.bf16.msra.mxu0 %v1158_v8  ;;  %v1393_v19 = vpack.c.bf16 %v202_v17, %v201_v14  ;;  %v28_v25 = vld [vmem:[%s1556_s0 + $0x30] sm:$0xff]  ;;  %v205_v27 = vld [vmem:[%s1558_s2 + $0x20] sm:$0xff]  ;;  %v206_v28 = vld [vmem:[%s1558_s2 + $0x28] sm:$0xff]  ;;  %v1170_v29 = vpack.c.bf16 %v87_v24, %v86_v23 }
   0x8   :  { %1163 = vmatprep.subr.bf16.mxu0 %v1162_v11  ;;  %v88_v30 = vld [vmem:[%s1557_s1 + $0x40] sm:$0xff]  ;;  %v89_v31 = vld [vmem:[%s1557_s1 + $0x48] sm:$0xff]  ;;  %v1427_v32 = vpack.c.bf16 %v206_v28, %v205_v27  ;;  %v207_v33 = vld [vmem:[%s1558_s2 + $0x30] sm:$0xff] }
   0x9   :  { %1192 = vmatpush3.bf16.msra.mxu1 %v1393_v19  ;;  %v208_v34 = vld [vmem:[%s1558_s2 + $0x38] sm:$0xff]  ;;  %v1174_v35 = vpack.c.bf16 %v89_v31, %v88_v30  ;;  %v90_v36 = vld [vmem:[%s1557_s1 + $0x50] sm:$0xff]  ;;  %v92_v40 = vld [vmem:[%s1557_s1 + $0x60] sm:$0xff] }
   0xa   :  { %45 = vperm.xlu0 %1291, %v26_v15   ;;  %48 = vperm.xlu1 %1292, %v27_v16   ;;  %v91_v37 = vld [vmem:[%s1557_s1 + $0x58] sm:$0xff]  ;;  %v1443_v38 = vpack.c.bf16 %v208_v34, %v207_v33  ;;  %v93_v41 = vld [vmem:[%s1557_s1 + $0x68] sm:$0xff]  ;;  %v94_v43 = vld [vmem:[%s1557_s1 + $0x70] sm:$0xff] }
   0xb   :  { %1165 = vmatpush3.bf16.msra.mxu0 %v1162_v11  ;;  %1193 = vmatprep.subr.bf16.mxu1 %v1314_v7  ;;  %v1178_v39 = vpack.c.bf16 %v91_v37, %v90_v36  ;;  %v1182_v42 = vpack.c.bf16 %v93_v41, %v92_v40  ;;  %v95_v44 = vld [vmem:[%s1557_s1 + $0x78] sm:$0xff]  ;;  %v864_v34 = vld [vmem:[%s1560_s3] ss:$0 sm:$0xff] }
   0xc   :  { %1167 = vmatprep.subr.bf16.mxu0 %v1166_v22  ;;  %v1186_v45 = vpack.c.bf16 %v95_v44, %v94_v43  ;;  %v29_v56 = vld [vmem:[%s1556_s0 + $0x38] sm:$0xff] }
   0xd   :  { %1195 = vmatpush3.bf16.msra.mxu1 %v1411_v26 }
   0xe   :  { %51 = vperm.xlu0 %1291, %v28_v25   ;;  %1196 = vmatprep.subr.bf16.mxu1 %v1314_v7 }
   0xf   :  { %1169 = vmatpush3.bf16.msra.mxu0 %v1166_v22  ;;  %54 = vperm.xlu1 %1292, %v29_v56  }
  0x10   :  { %1171 = vmatprep.subr.bf16.mxu0 %v1170_v29 }
  0x11   :  { %1198 = vmatpush3.bf16.msra.mxu1 %v1427_v32 }
  0x12   :  { %1199 = vmatprep.subr.bf16.mxu1 %v1314_v7 }
  0x13   :  { %1173 = vmatpush3.bf16.msra.mxu0 %v1170_v29 }
  0x14   :  { %1175 = vmatprep.subr.bf16.mxu0 %v1174_v35 }
  0x15   :  { %1201 = vmatpush3.bf16.msra.mxu1 %v1443_v38 }
  0x16   :  { %1202 = vmatprep.subr.bf16.mxu1 %v1314_v7 }
  0x17   :  { %1177 = vmatpush3.bf16.msra.mxu0 %v1174_v35 }
  0x18   :  { %1179 = vmatprep.subr.bf16.mxu0 %v1178_v39  ;;  %1023 = vmatmul.mubr.f32.vlgmr.msra.gmra.mrb[0].mxu1 %v1316_v18 }
  0x19   :  { %1204 = vmatpush3.bf16.msra.mxu1 %v1393_v19  ;;  %1041 = vmatprep.mubr.msk.f32.mxu1 %vm1315_vm0, %v1316_v18 }
  0x1a   :  { %1205 = vmatprep.subr.bf16.mxu1 %v1314_v7 }
  0x1b   :  { %1181 = vmatpush3.bf16.msra.mxu0 %v1178_v39 }
  0x1c   :  { %1183 = vmatprep.subr.bf16.mxu0 %v1182_v42 }
  0x1d   :  { %1207 = vmatpush3.bf16.msra.mxu1 %v1411_v26 }
  0x1e   :  { %1208 = vmatprep.subr.bf16.mxu1 %v1314_v7 }
  0x1f   :  { %1185 = vmatpush3.bf16.msra.mxu0 %v1182_v42 }
  0x20   :  { %1187 = vmatprep.subr.bf16.mxu0 %v1186_v45 }
  0x21   :  { %1210 = vmatpush3.bf16.msra.mxu1 %v1427_v32 }
  0x22   :  { %1211 = vmatprep.subr.bf16.mxu1 %v1314_v7 }
  0x23   :  { %1189 = vmatpush3.bf16.msra.mxu0 %v1186_v45 }
  0x24   :  { %1214 = vmatprep.subr.bf16.mxu0 %v1314_v7 }
  0x25   :  { %1213 = vmatpush3.bf16.msra.mxu1 %v1443_v38 }
  0x26   :  { %1226 = vmatprep.subr.bf16.mxu1 %v1314_v7 }
  0x81   :  { %v34_v48 = vpop.permute.xlu0 %33  ;;  %v40_v49 = vpop.permute.xlu1 %39 }
  0x82   :  { %vm56_vm1 = vcmp.eq.s32.totalorder %v34_v48, %v31_v47  ;;  %vm58_vm2 = vcmp.eq.s32.totalorder %v40_v49, %v31_v47 }
  0x83   :  { %994 = vmatprep.mubr.msk.f32.mxu0 %vm56_vm1, %v1317_v50 }
  0x85   :  { %v37_v51 = vpop.permute.xlu0 %36  ;;  %v43_v52 = vpop.permute.xlu1 %42 }
  0x86   :  { %vm57_vm3 = vcmp.eq.s32.totalorder %v37_v51, %v31_v47  ;;  %vm59_vm4 = vcmp.eq.s32.totalorder %v43_v52, %v31_v47 }
  0x87   :  { %995 = vmatmul.mubr.msk.f32.vlgmr.msra.gmra.mrb[0].mxu0 %vm57_vm3, %v1317_v50 }
  0x88   :  { %997 = vmatprep.mubr.msk.f32.mxu0 %vm58_vm2, %v1317_v50  ;;  %1216 = vmatpush3.bf16.msra.mxu0 %v1393_v19 }
  0x89   :  { %v46_v53 = vpop.permute.xlu0 %45  ;;  %v49_v54 = vpop.permute.xlu1 %48  ;;  %1217 = vmatprep.subr.bf16.mxu0 %v1314_v7 }
  0x8a   :  { %vm60_vm5 = vcmp.eq.s32.totalorder %v46_v53, %v31_v47  ;;  %vm61_vm6 = vcmp.eq.s32.totalorder %v49_v54, %v31_v47 }
  0x8b   :  { %998 = vmatmul.mubr.msk.f32.gmra.mrb[2].mxu0 %vm59_vm4, %v1317_v50 }
  0x8c   :  { %1000 = vmatprep.mubr.msk.f32.mxu0 %vm60_vm5, %v1317_v50  ;;  %1219 = vmatpush3.bf16.msra.mxu0 %v1411_v26 }
  0x8d   :  { %v52_v55 = vpop.permute.xlu0 %51  ;;  %1220 = vmatprep.subr.bf16.mxu0 %v1314_v7 }
  0x8e   :  { %vm62_vm7 = vcmp.eq.s32.totalorder %v52_v55, %v31_v47  ;;  %v55_v63 = vpop.permute.xlu1 %54 }
  0x8f   :  { %1001 = vmatmul.mubr.msk.f32.gmra.mrb[4].mxu0 %vm61_vm6, %v1317_v50  ;;  %vm63_vm9 = vcmp.eq.s32.totalorder %v55_v63, %v31_v47 }
  0x90   :  { %1003 = vmatprep.mubr.msk.f32.mxu0 %vm62_vm7, %v1317_v50  ;;  %1222 = vmatpush3.bf16.msra.mxu0 %v1427_v32 }
  0x91   :  { %1223 = vmatprep.subr.bf16.mxu0 %v1314_v7 }
  0x93   :  { %1004 = vmatmul.mubr.msk.f32.gmra.mrb[6].mxu0 %vm63_vm9, %v1317_v50 }
  0x94   :  { %1225 = vmatpush3.bf16.msra.mxu0 %v1443_v38  ;;  %1060 = vmatprep.mubr.msk.f32.mxu0 %vm1315_vm0, %v1316_v18 }
  0x95   :  { %1238 = vmatprep.subr.bf16.mxu0 %v1314_v7 }
  0xeb   :  { %v279_v57 = vpop.f32.mrb[0].mxu1 }
  0xec   :  { %v1024_v58 = vpop.f32.mrb[1].mxu1 }
 0x15a   :  { %v996_v59 = vpop.f32.mrb[0].mxu0 }
 0x15b   :  { %v162_v60 = vpop.f32.mrb[1].mxu0 }
 0x15c   :  { %v283_v61 = vadd.f32 %v279_v57, %v162_v60 }
 0x15e   :  { %1293 = vtanh.f32 %v283_v61  ;;  %v999_v0 = vpop.f32.mrb[2].mxu0 }
 0x15f   :  { %v172_v1 = vpop.f32.mrb[3].mxu0 }
 0x162   :  { %v1496_v2 = vpop.f32.mrb[4].mxu0 }
 0x163   :  { %v182_v3 = vpop.f32.mrb[5].mxu0 }
 0x166   :  { %v1498_v8 = vpop.f32.mrb[6].mxu0 }
 0x167   :  { %v192_v9 = vpop.f32.mrb[7].mxu0 }
 0x168   :  { %v1294_v62 = vpop.eup %1293 }
 0x169   :  { %1042 = vmatmul.mubr.msk.f32.vlgmr.msra.gmra.mrb[2].mxu1 %vm209_vm8, %v1294_v62 }
 0x16a   :  { %1228 = vmatpush3.bf16.msra.mxu1 %v1393_v19  ;;  %1079 = vmatprep.mubr.msk.f32.mxu1 %vm1315_vm0, %v1316_v18 }
 0x16b   :  { %1229 = vmatprep.subr.bf16.mxu1 %v1314_v7 }
 0x16e   :  { %1231 = vmatpush3.bf16.msra.mxu1 %v1411_v26 }
 0x16f   :  { %1232 = vmatprep.subr.bf16.mxu1 %v1314_v7 }
 0x172   :  { %1234 = vmatpush3.bf16.msra.mxu1 %v1427_v32 }
 0x173   :  { %1235 = vmatprep.subr.bf16.mxu1 %v1314_v7 }
 0x176   :  { %1237 = vmatpush3.bf16.msra.mxu1 %v1443_v38 }
 0x177   :  { %1250 = vmatprep.subr.bf16.mxu1 %v1314_v7 }
 0x23c   :  { %v354_v4 = vpop.f32.mrb[2].mxu1 }
 0x23d   :  { %v358_v5 = vadd.f32 %v996_v59, %v354_v4  ;;  %v1043_v6 = vpop.f32.mrb[3].mxu1 }
 0x23f   :  { %1295 = vtanh.f32 %v358_v5 }
 0x249   :  { %v1296_v10 = vpop.eup %1295 }
 0x24a   :  { %1061 = vmatmul.mubr.msk.f32.vlgmr.msra.gmra.mrb[8].mxu0 %vm209_vm8, %v1296_v10 }
 0x24b   :  { %1240 = vmatpush3.bf16.msra.mxu0 %v1393_v19  ;;  %1098 = vmatprep.mubr.msk.f32.mxu0 %vm1315_vm0, %v1316_v18 }
 0x24c   :  { %1241 = vmatprep.subr.bf16.mxu0 %v1314_v7 }
 0x24f   :  { %1243 = vmatpush3.bf16.msra.mxu0 %v1411_v26 }
 0x250   :  { %1244 = vmatprep.subr.bf16.mxu0 %v1314_v7 }
 0x253   :  { %1246 = vmatpush3.bf16.msra.mxu0 %v1427_v32 }
 0x254   :  { %1247 = vmatprep.subr.bf16.mxu0 %v1314_v7 }
 0x257   :  { %1249 = vmatpush3.bf16.msra.mxu0 %v1443_v38 }
 0x258   :  { %1262 = vmatprep.subr.bf16.mxu0 %v1314_v7 }
 0x31d   :  { %v429_v11 = vpop.f32.mrb[8].mxu0 }
 0x31e   :  { %v433_v12 = vadd.f32 %v429_v11, %v172_v1  ;;  %v1062_v13 = vpop.f32.mrb[9].mxu0 }
 0x320   :  { %1297 = vtanh.f32 %v433_v12 }
 0x32a   :  { %v1298_v14 = vpop.eup %1297 }
 0x32b   :  { %1080 = vmatmul.mubr.msk.f32.vlgmr.msra.gmra.mrb[4].mxu1 %vm209_vm8, %v1298_v14 }
 0x32c   :  { %1252 = vmatpush3.bf16.msra.mxu1 %v1393_v19  ;;  %1117 = vmatprep.mubr.msk.f32.mxu1 %vm1315_vm0, %v1316_v18 }
 0x32d   :  { %1253 = vmatprep.subr.bf16.mxu1 %v1314_v7 }
 0x330   :  { %1255 = vmatpush3.bf16.msra.mxu1 %v1411_v26 }
 0x331   :  { %1256 = vmatprep.subr.bf16.mxu1 %v1314_v7 }
 0x334   :  { %1258 = vmatpush3.bf16.msra.mxu1 %v1427_v32 }
 0x335   :  { %1259 = vmatprep.subr.bf16.mxu1 %v1314_v7 }
 0x338   :  { %1261 = vmatpush3.bf16.msra.mxu1 %v1443_v38 }
 0x339   :  { %1274 = vmatprep.subr.bf16.mxu1 %v1314_v7 }
 0x3fe   :  { %v504_v15 = vpop.f32.mrb[4].mxu1 }
 0x3ff   :  { %v508_v16 = vadd.f32 %v999_v0, %v504_v15  ;;  %v1081_v17 = vpop.f32.mrb[5].mxu1 }
 0x401   :  { %1299 = vtanh.f32 %v508_v16 }
 0x40b   :  { %v1300_v20 = vpop.eup %1299 }
 0x40c   :  { %1099 = vmatmul.mubr.msk.f32.vlgmr.msra.gmra.mrb[10].mxu0 %vm209_vm8, %v1300_v20 }
 0x40d   :  { %1264 = vmatpush3.bf16.msra.mxu0 %v1393_v19  ;;  %1136 = vmatprep.mubr.msk.f32.mxu0 %vm1315_vm0, %v1316_v18 }
 0x40e   :  { %1265 = vmatprep.subr.bf16.mxu0 %v1314_v7 }
 0x411   :  { %1267 = vmatpush3.bf16.msra.mxu0 %v1411_v26 }
 0x412   :  { %1268 = vmatprep.subr.bf16.mxu0 %v1314_v7 }
 0x415   :  { %1270 = vmatpush3.bf16.msra.mxu0 %v1427_v32 }
 0x416   :  { %1271 = vmatprep.subr.bf16.mxu0 %v1314_v7 }
 0x419   :  { %1273 = vmatpush3.bf16.msra.mxu0 %v1443_v38 }
 0x4df   :  { %v579_v21 = vpop.f32.mrb[10].mxu0 }
 0x4e0   :  { %v583_v22 = vadd.f32 %v579_v21, %v182_v3  ;;  %v1100_v23 = vpop.f32.mrb[11].mxu0 }
 0x4e2   :  { %1301 = vtanh.f32 %v583_v22 }
 0x4ec   :  { %v1302_v24 = vpop.eup %1301 }
 0x4ed   :  { %1118 = vmatmul.mubr.msk.f32.vlgmr.msra.gmra.mrb[6].mxu1 %vm209_vm8, %v1302_v24 }
 0x4ee   :  { %1276 = vmatpush3.bf16.msra.mxu1 %v1393_v19  ;;  %1155 = vmatprep.mubr.msk.f32.mxu1 %vm1315_vm0, %v1316_v18 }
 0x4ef   :  { %1277 = vmatprep.subr.bf16.mxu1 %v1314_v7 }
 0x4f2   :  { %1279 = vmatpush3.bf16.msra.mxu1 %v1411_v26 }
 0x4f3   :  { %1280 = vmatprep.subr.bf16.mxu1 %v1314_v7 }
 0x4f6   :  { %1282 = vmatpush3.bf16.msra.mxu1 %v1427_v32 }
 0x4f7   :  { %1283 = vmatprep.subr.bf16.mxu1 %v1314_v7  ;;  %v10_v7 = vstv %s1559_s4 }
 0x4f8   :  { %11 = vst [vmem:[#allocation2] sm:$0x1] %v10_v7 }
 0x4fa   :  { %1285 = vmatpush3.bf16.msra.mxu1 %v1443_v38 }
 0x4ff   :  { %v865_v38 = vld [vmem:[#allocation2] ss:$0 sm:$0xff] }
 0x5c0   :  { %v654_v25 = vpop.f32.mrb[6].mxu1 }
 0x5c1   :  { %v658_v27 = vadd.f32 %v1496_v2, %v654_v25  ;;  %v1119_v28 = vpop.f32.mrb[7].mxu1 }
 0x5c3   :  { %1303 = vtanh.f32 %v658_v27 }
 0x5cd   :  { %v1304_v19 = vpop.eup %1303 }
 0x5ce   :  { %1137 = vmatmul.mubr.msk.f32.vlgmr.msra.gmra.mrb[12].mxu0 %vm209_vm8, %v1304_v19 }
 0x6a1   :  { %v729_v18 = vpop.f32.mrb[12].mxu0 }
 0x6a2   :  { %v733_v29 = vadd.f32 %v729_v18, %v192_v9  ;;  %v1138_v30 = vpop.f32.mrb[13].mxu0 }
 0x6a4   :  { %1305 = vtanh.f32 %v733_v29 }
 0x6ae   :  { %v1306_v26 = vpop.eup %1305 }
 0x6af   :  { %1156 = vmatmul.mubr.msk.f32.vlgmr.msra.gmra.mrb[8].mxu1 %vm209_vm8, %v1306_v26 }
 0x782   :  { %v804_v31 = vpop.f32.mrb[8].mxu1 }
 0x783   :  { %v808_v32 = vadd.f32 %v1498_v8, %v804_v31  ;;  %v1157_v33 = vpop.f32.mrb[9].mxu1 }
 0x785   :  { %1307 = vtanh.f32 %v808_v32 }
 0x78f   :  { %v1308_v35 = vpop.eup %1307 }
 0x790   :  { %v817_v36 = vmul.f32 %v1308_v35, %v864_v34 }
 0x792   :  { %v818_v37 = vsel %vm209_vm8, %v817_v36, 0.0 }
 0x793   :  { %819 = vadd.xlane.f32.xlu0 %v818_v37 }
 0x820   :  { %v820_v39 = vpop.xlane.xlu0 %819 }
 0x821   :  { %v828_v40 = vadd.f32 %v865_v38, %v820_v39 }
 0x823   :  { %v829_v41 = vsub.f32 0.0, %v828_v40 }
 0x825   :  { %v830_v42 = vmul.f32 1.442695, %v829_v41 }
 0x827   :  { %1309 = vpow2.f32 %v830_v42 }
 0x831   :  { %v1310_v43 = vpop.eup %1309 }
 0x832   :  { %v832_v44 = vadd.f32 1.0, %v1310_v43 }
 0x834   :  { %1311 = vrcp.f32 %v832_v44 }
 0x83e   :  { %v1312_v45 = vpop.eup %1311 }
 0x83f   :  { %836 = vst.msk [vmem:[%s1561_s5] sm:$0xff] %vm835_vm10, %v1312_v45 }

</bundles_post_ra>
